<compile_context>
chip_gen: v7x
topology: tpu7x:2x2x1
jax: 0.10.0
libtpu: 0.0.40
codegen_flags: <defaults>
</compile_context>

<pallas_src>
from functools import partial

import jax
import jax.numpy as jnp
from jax.experimental import pallas as pl
from jax.experimental.pallas import tpu as pltpu


def task_layer_kernel(x_ref, w_ref, shift_ref, o_ref):
    # x_ref:     (Bb*H, W*Cin)      input slab for this grid block
    # w_ref:     (3, W*Cin, WoCp)   BN-scale-folded banded weights (lane-padded)
    # shift_ref: (1, WoCp)          BN shift, tiled over Wo, lane-padded with 0
    # o_ref:     (Bb, H, WoCp)      row/lane-padded output (rows Ho..H-1 junk)
    Bb, H, WoCp = o_ref.shape
    BH = x_ref.shape[0]

    x = x_ref[...]                                            # (BH, WC)
    # One tall matmul per kernel row dy (M = BH, sublane-aligned, unmasked).
    r0 = jnp.dot(x, w_ref[0], preferred_element_type=jnp.float32)
    r1 = jnp.dot(x, w_ref[1], preferred_element_type=jnp.float32)
    r2 = jnp.dot(x, w_ref[2], preferred_element_type=jnp.float32)
    # out[i] = r0[i] + r1[i+1] + r2[i+2]: combine with XLU sublane rolls
    # instead of unaligned row slices (which force shifted VMEM copies).
    acc = (r0
           + pltpu.roll(r1, BH - 1, 0)
           + pltpu.roll(r2, BH - 2, 0))
    # Fused BatchNorm shift (scale already folded into weights) + ReLU.
    y = jnp.maximum(acc + shift_ref[...], 0.0)
    o_ref[...] = y.reshape(Bb, H, WoCp).astype(o_ref.dtype)


def _choose_num_blocks(batch, per_batch_bytes, min_block_bytes=1 << 20):
    """Only split the batch across grid steps when each block carries enough
    work (>= ~1 MiB of input) to amortize the ~0.35 us/step overhead and the
    duplicated weight DMA; at the tiny test shape this returns 1."""
    nb = int(max(1, min(batch, (batch * per_batch_bytes) // min_block_bytes)))
    while batch % nb:
        nb -= 1
    return nb


def _build_banded_weights(conv_weight, scale, W, Wo, WoCp, compute_dtype):
    """Fold the BN scale and the 3 dx taps into one (W*Cin, WoCp) banded
    ("Toeplitz") matrix per kernel row dy, so the conv becomes 3 deep matmuls.
    The last WoCp - Wo*Cout lanes are zero (lane padding to 128)."""
    Cout, Cin = conv_weight.shape[0], conv_weight.shape[1]
    # OIHW -> HWIO, fold BN scale into output channels.
    w_hwio = jnp.transpose(conv_weight, (2, 3, 1, 0)).astype(jnp.float32)
    w_hwio = w_hwio * scale[None, None, None, :]              # (3, 3, Cin, Cout)

    w_idx = jnp.arange(W)                                     # absolute input col
    wo_idx = jnp.arange(Wo)                                   # output col
    dx = w_idx[:, None] - wo_idx[None, :]                     # (W, Wo)
    valid = ((dx >= 0) & (dx <= 2)).astype(jnp.float32)
    dx_c = jnp.clip(dx, 0, 2)

    # taps[dy, w, wo, ci, co] = w_hwio[dy, w - wo, ci, co] if 0 <= w-wo <= 2
    taps = w_hwio[:, dx_c] * valid[None, :, :, None, None]    # (3, W, Wo, Cin, Cout)
    w_toep = jnp.transpose(taps, (0, 1, 3, 2, 4)).reshape(3, W * Cin, Wo * Cout)
    w_toep = jnp.pad(w_toep, ((0, 0), (0, 0), (0, WoCp - Wo * Cout)))
    return w_toep.astype(compute_dtype)


def task_layer_nhwc(x_nhwc, conv_weight, gamma, beta, running_mean, running_var,
                    *, eps=1e-5, compute_dtype=jnp.float32, out_dtype=None):
    """Core NHWC entry point (no layout transposes). x_nhwc: (B, H, W, Cin)."""
    B, H, W, Cin = x_nhwc.shape
    Cout = conv_weight.shape[0]
    Ho, Wo = H - 2, W - 2                                     # k=3, pad=0, stride=1
    WC, WoC = W * Cin, Wo * Cout
    WoCp = max(128, ((WoC + 127) // 128) * 128)               # lane-dense output width
    out_dtype = x_nhwc.dtype if out_dtype is None else out_dtype

    scale = (gamma / jnp.sqrt(running_var + eps)).astype(jnp.float32)
    shift = (beta - running_mean * scale).astype(jnp.float32)
    shift2d = jnp.pad(jnp.tile(shift, Wo), (0, WoCp - WoC)).reshape(1, WoCp)

    # NOTE: with compute_dtype=bfloat16 the BN scale is folded into the weights
    # *before* the bf16 cast; only the f32 path is validated below.
    w_toep = _build_banded_weights(conv_weight, scale, W, Wo, WoCp, compute_dtype)
    x2d = x_nhwc.reshape(B * H, WC).astype(compute_dtype)     # contiguous reshape

    in_item = jnp.dtype(compute_dtype).itemsize
    out_item = jnp.dtype(out_dtype).itemsize
    nb = _choose_num_blocks(B, H * WC * in_item)
    Bb = B // nb

    cost = pl.CostEstimate(
        flops=2 * 3 * B * H * WC * WoCp,    # FLOPs actually issued (banded form)
        transcendentals=0,
        bytes_accessed=(B * H * WC + 3 * WC * WoCp) * in_item
                       + WoCp * 4 + B * H * WoCp * out_item)

    out_pad = pl.pallas_call(
        task_layer_kernel,
        out_shape=jax.ShapeDtypeStruct((B, H, WoCp), out_dtype),
        grid=(nb,),
        in_specs=[
            pl.BlockSpec((Bb * H, WC), lambda i: (i, 0)),
            pl.BlockSpec((3, WC, WoCp), lambda i: (0, 0, 0)),
            pl.BlockSpec((1, WoCp), lambda i: (0, 0)),
        ],
        out_specs=pl.BlockSpec((Bb, H, WoCp), lambda i: (i, 0, 0)),
        compiler_params=pltpu.CompilerParams(
            dimension_semantics=("parallel",)),
        cost_estimate=cost,
    )(x2d, w_toep, shift2d)
    # TODO(synk): production image sizes need a (batch, Ho-tile) "parallel" grid
    # with a 2-row input halo and a Wo-tiled banded weight (the full Toeplitz RHS
    # is O(W^2) VMEM, double-buffered, and issues ~W/3x the useful FLOPs), plus a
    # raised vmem_limit_bytes on v5e.

    return out_pad[:, :Ho, :WoC].reshape(B, Ho, Wo, Cout)     # NHWC output


@partial(jax.jit, static_argnames=("eps", "compute_dtype", "out_dtype"))
def task_layer(x_nchw, conv_weight, gamma, beta, running_mean, running_var,
               *, eps=1e-5, compute_dtype=jnp.float32, out_dtype=None):
    """PyTorch-compatible NCHW interface.
    x_nchw: (B, Cin, H, W); conv_weight: (Cout, Cin, 3, 3) [OIHW]."""
    x_nhwc = jnp.transpose(x_nchw, (0, 2, 3, 1))
    out_nhwc = task_layer_nhwc(x_nhwc, conv_weight, gamma, beta,
                               running_mean, running_var,
                               eps=eps, compute_dtype=compute_dtype,
                               out_dtype=out_dtype)
    return jnp.transpose(out_nhwc, (0, 3, 1, 2))              # back to NCHW


def _reference(x_nchw, conv_weight, gamma, beta, running_mean, running_var,
               eps=1e-5):
    y = jax.lax.conv_general_dilated(
        x_nchw, conv_weight, window_strides=(1, 1), padding="VALID",
        dimension_numbers=("NCHW", "OIHW", "NCHW"))
    scale = gamma / jnp.sqrt(running_var + eps)
    shift = beta - running_mean * scale
    y = y * scale[None, :, None, None] + shift[None, :, None, None]
    return jnp.maximum(y, 0.0)


if __name__ == "__main__":
    # Small shapes consistent with the module: TaskLayer(input_channels=4,
    # out_channels=8, norm_cfg=dict(type='BN')) applied to x of shape (2,4,16,16).
    B, Cin, Cout, H, W = 2, 4, 8, 16, 16

    key = jax.random.PRNGKey(0)
    kx, kw, kg, kb, km, kv = jax.random.split(key, 6)

    x = jax.random.normal(kx, (B, Cin, H, W), jnp.float32)
    conv_weight = jax.random.normal(kw, (Cout, Cin, 3, 3), jnp.float32) * 0.1
    gamma = 1.0 + 0.1 * jax.random.normal(kg, (Cout,), jnp.float32)
    beta = 0.1 * jax.random.normal(kb, (Cout,), jnp.float32)
    running_mean = 0.1 * jax.random.normal(km, (Cout,), jnp.float32)
    running_var = 0.5 + jnp.abs(jax.random.normal(kv, (Cout,), jnp.float32))
    # TODO(synk): PyTorch BatchNorm2d in train() mode uses batch statistics;
    # this kernel implements the deterministic eval-mode (running-stats) path.

    out = task_layer(x, conv_weight, gamma, beta, running_mean, running_var,
                     compute_dtype=jnp.float32)
    out = jax.block_until_ready(out)

    ref = _reference(x, conv_weight, gamma, beta, running_mean, running_var)
    assert out.shape == (B, Cout, H - 2, W - 2)
    assert jnp.allclose(out, ref, atol=1e-4, rtol=1e-4), \
        float(jnp.max(jnp.abs(out - ref)))

    print("KERNEL_OK")
</pallas_src>

<mosaic_0001>
module attributes {stable_mosaic.version = 11 : i64} {
  func.func @task_layer_kernel(%arg0: i32, %arg1: memref<32x64xf32, #tpu.memory_space<vmem>>, %arg2: memref<3x64x128xf32, #tpu.memory_space<vmem>>, %arg3: memref<1x128xf32, #tpu.memory_space<vmem>>, %arg4: memref<2x16x128xf32, #tpu.memory_space<vmem>>) attributes {dimension_semantics = [#tpu.dimension_semantics<parallel>], iteration_bounds = array<i64: 1>, scalar_prefetch = 0 : i64, scratch_operands = 0 : i64, tpu.core_type = #tpu.core_type<tc>, window_params = [{transform_indices = @transform_0, window_bounds = array<i64: 32, 64>}, {pipeline_mode = #tpu.pipeline_mode<synchronous>, transform_indices = @transform_1, window_bounds = array<i64: 3, 64, 128>}, {pipeline_mode = #tpu.pipeline_mode<synchronous>, transform_indices = @transform_2, window_bounds = array<i64: 1, 128>}, {transform_indices = @transform_3, window_bounds = array<i64: 2, 16, 128>}]} {
    %c0 = arith.constant 0 : index
    %c0_0 = arith.constant 0 : index
    %0 = vector.load %arg1[%c0, %c0_0] : memref<32x64xf32, #tpu.memory_space<vmem>>, vector<32x64xf32>
    %c0_1 = arith.constant 0 : index
    %c0_2 = arith.constant 0 : index
    %c0_3 = arith.constant 0 : index
    %1 = vector.load %arg2[%c0_1, %c0_2, %c0_3] : memref<3x64x128xf32, #tpu.memory_space<vmem>>, vector<1x64x128xf32>
    %2 = vector.shape_cast %1 : vector<1x64x128xf32> to vector<64x128xf32>
    %cst = arith.constant dense<0.000000e+00> : vector<32x128xf32>
    %3 = tpu.matmul %0, %2, %cst {dimension_numbers = #tpu.dot_dimension_numbers<[1], [0], [0], [1], [0, 0, 1, 1], [], []>} : vector<32x64xf32>, vector<64x128xf32>, vector<32x128xf32> -> vector<32x128xf32>
    %c1 = arith.constant 1 : index
    %c0_4 = arith.constant 0 : index
    %c0_5 = arith.constant 0 : index
    %4 = vector.load %arg2[%c1, %c0_4, %c0_5] : memref<3x64x128xf32, #tpu.memory_space<vmem>>, vector<1x64x128xf32>
    %5 = vector.shape_cast %4 : vector<1x64x128xf32> to vector<64x128xf32>
    %cst_6 = arith.constant dense<0.000000e+00> : vector<32x128xf32>
    %6 = tpu.matmul %0, %5, %cst_6 {dimension_numbers = #tpu.dot_dimension_numbers<[1], [0], [0], [1], [0, 0, 1, 1], [], []>} : vector<32x64xf32>, vector<64x128xf32>, vector<32x128xf32> -> vector<32x128xf32>
    %c2 = arith.constant 2 : index
    %c0_7 = arith.constant 0 : index
    %c0_8 = arith.constant 0 : index
    %7 = vector.load %arg2[%c2, %c0_7, %c0_8] : memref<3x64x128xf32, #tpu.memory_space<vmem>>, vector<1x64x128xf32>
    %8 = vector.shape_cast %7 : vector<1x64x128xf32> to vector<64x128xf32>
    %cst_9 = arith.constant dense<0.000000e+00> : vector<32x128xf32>
    %9 = tpu.matmul %0, %8, %cst_9 {dimension_numbers = #tpu.dot_dimension_numbers<[1], [0], [0], [1], [0, 0, 1, 1], [], []>} : vector<32x64xf32>, vector<64x128xf32>, vector<32x128xf32> -> vector<32x128xf32>
    %c31_i32 = arith.constant 31 : i32
    %10 = tpu.dynamic_rotate %6 by %c31_i32 dim 0 : vector<32x128xf32>, i32 -> vector<32x128xf32>
    %11 = arith.addf %3, %10 : vector<32x128xf32>
    %c30_i32 = arith.constant 30 : i32
    %12 = tpu.dynamic_rotate %9 by %c30_i32 dim 0 : vector<32x128xf32>, i32 -> vector<32x128xf32>
    %13 = arith.addf %11, %12 : vector<32x128xf32>
    %c0_10 = arith.constant 0 : index
    %c0_11 = arith.constant 0 : index
    %14 = vector.load %arg3[%c0_10, %c0_11] : memref<1x128xf32, #tpu.memory_space<vmem>>, vector<1x128xf32>
    %15 = vector.broadcast %14 : vector<1x128xf32> to vector<32x128xf32>
    %16 = arith.addf %13, %15 : vector<32x128xf32>
    %cst_12 = arith.constant 0.000000e+00 : f32
    %17 = vector.broadcast %cst_12 : f32 to vector<32x128xf32>
    %18 = arith.maximumf %16, %17 : vector<32x128xf32>
    %19 = vector.shape_cast %18 : vector<32x128xf32> to vector<2x16x128xf32>
    %c0_13 = arith.constant 0 : index
    %c0_14 = arith.constant 0 : index
    %c0_15 = arith.constant 0 : index
    %20 = vector.load %arg4[%c0_13, %c0_14, %c0_15] : memref<2x16x128xf32, #tpu.memory_space<vmem>>, vector<2x16x128xf32>
    tpu.vector_store %arg4[%c0_13, %c0_14, %c0_15], %19 {strides = array<i32>} : memref<2x16x128xf32, #tpu.memory_space<vmem>>, vector<2x16x128xf32>,
    return
  }
  func.func @transform_0(%arg0: i32) -> (i32, i32) {
    %c0_i32 = arith.constant 0 : i32
    %c0_i32_0 = arith.constant 0 : i32
    return %arg0, %c0_i32 : i32, i32
  }
  func.func @transform_1(%arg0: i32) -> (i32, i32, i32) {
    %c0_i32 = arith.constant 0 : i32
    %c0_i32_0 = arith.constant 0 : i32
    %c0_i32_1 = arith.constant 0 : i32
    %c0_i32_2 = arith.constant 0 : i32
    return %c0_i32, %c0_i32_0, %c0_i32_1 : i32, i32, i32
  }
  func.func @transform_2(%arg0: i32) -> (i32, i32) {
    %c0_i32 = arith.constant 0 : i32
    %c0_i32_0 = arith.constant 0 : i32
    %c0_i32_1 = arith.constant 0 : i32
    return %c0_i32, %c0_i32_0 : i32, i32
  }
  func.func @transform_3(%arg0: i32) -> (i32, i32, i32) {
    %c0_i32 = arith.constant 0 : i32
    %c0_i32_0 = arith.constant 0 : i32
    %c0_i32_1 = arith.constant 0 : i32
    return %arg0, %c0_i32, %c0_i32_0 : i32, i32, i32
  }
}

</mosaic_0001>

<bundles_post_ra>
// kernel: tile.8
= control target key start
LH: loop header
LB: loop body
LE: loop exit
PB: predicated region body
PF: predicated region fallthrough
CT: control target
= control target key end

     0   :  { %s28_s0 = inlined_call_operand.vmem [shape: f32[8], index: 0, kind: input, shape index: {}]   ;;  %s29_s1 = inlined_call_operand.vmem [shape: f32[14,8], index: 1, kind: output, shape index: {}]  }
   0x1   :  { %v4_v0 = vld [vmem:[%s28_s0] ss:$0 sm:$0xff] }
   0x2   :  { %5 = vst [vmem:[%s29_s1] sm:$0xff] %v4_v0  ;;  %8 = vst [vmem:[%s29_s1 + $0x8] sm:$0xff] %v4_v0 }

// kernel: tile.9
= control target key start
LH: loop header
LB: loop body
LE: loop exit
PB: predicated region body
PF: predicated region fallthrough
CT: control target
= control target key end

     0   :  { %s115_s10 = smov 104   ;;  %s116_s11 = smov 88   ;;  %vm3_vm0 = vcmask 64512   ;;  %vm9_vm1 = vcmask 917312   ;;  %vm15_vm2 = vcmask 851712   ;;  %vm21_vm3 = vcmask 786112   ;;  %s183_s0 = inlined_call_operand.vmem [shape: f32[14,8], index: 0, kind: input, shape index: {}]   ;;  %s184_s1 = inlined_call_operand.vmem [shape: f32[112], index: 1, kind: output, shape index: {}]  }
   0x1   :  { %v89_v0 = vld [vmem:[%s183_s0 + $0xd] sm:$0x1]   ;;  %v91_v1 = vld [vmem:[%s183_s0 + $0xb] sm:$0x1]   ;;  %v90_v2 = vld [vmem:[%s183_s0 + $0xc] sm:$0x1]  }
   0x2   :  { %7 = vrot.lane.b32.xlu0 %v89_v0, %s115_s10  ;;  %19 = vrot.lane.b32.xlu1 %v91_v1, %s116_s11  ;;  %v92_v3 = vld [vmem:[%s183_s0 + $0xa] sm:$0x1]   ;;  %s117_s16 = smov 96   ;;  %s118_s17 = smov 80   ;;  %v93_v4 = vld [vmem:[%s183_s0 + $0x9] sm:$0x1]  }
   0x3   :  { %v94_v5 = vld [vmem:[%s183_s0 + $0x8] sm:$0x1]   ;;  %v2_v6 = vld [vmem:[%s183_s0] sm:$0x1]   ;;  %s119_s24 = smov 72   ;;  %s120_s25 = smov 64  }
   0x4   :  { %4 = vst.msk [vmem:[#allocation0] sm:$0x1] %vm3_vm0, %v2_v6   ;;  %v95_v7 = vld [vmem:[%s183_s0 + $0x7] sm:$0x1]   ;;  %v96_v8 = vld [vmem:[%s183_s0 + $0x6] sm:$0x1]  }
   0x5   :  { %s121_s30 = smov 56   ;;  %s122_s2 = smov 48   ;;  %v97_v9 = vld [vmem:[%s183_s0 + $0x5] sm:$0x1]   ;;  %v98_v10 = vld [vmem:[%s183_s0 + $0x4] sm:$0x1]  }
   0x6   :  { %13 = vrot.lane.b32.xlu0 %v90_v2, %s117_s16  ;;  %25 = vrot.lane.b32.xlu1 %v92_v3, %s118_s17  ;;  %s123_s7 = smov 40   ;;  %s124_s8 = smov 32   ;;  %v99_v11 = vld [vmem:[%s183_s0 + $0x3] sm:$0x1]   ;;  %v100_v12 = vld [vmem:[%s183_s0 + $0x2] sm:$0x1]  }
   0x7   :  { %s125_s13 = smov 24   ;;  %s126_s14 = smov 16   ;;  %v101_v13 = vld [vmem:[%s183_s0 + $0x1] sm:$0x1]   ;;  %vm27_vm4 = vcmask 720512   ;;  %vm33_vm5 = vcmask 654912  }
   0x8   :  { %s127_s0 = smov 8   ;;  %vm39_vm6 = vcmask 589312   ;;  %vm45_vm7 = vcmask 523712   ;;  %vm51_vm8 = vcmask 458112   ;;  %vm57_vm9 = vcmask 392512  }
   0x9   :  { %vm63_vm10 = vcmask 326912   ;;  %vm69_vm11 = vcmask 261312   ;;  %vm75_vm12 = vcmask 195712   ;;  %vm81_vm13 = vcmask 130112  }
   0xa   :  { %31 = vrot.lane.b32.xlu0 %v93_v4, %s119_s24  ;;  %37 = vrot.lane.b32.xlu1 %v94_v5, %s120_s25 }
   0xe   :  { %43 = vrot.lane.b32.xlu0 %v95_v7, %s121_s30  ;;  %49 = vrot.lane.b32.xlu1 %v96_v8, %s122_s2 }
  0x12   :  { %55 = vrot.lane.b32.xlu0 %v97_v9, %s123_s7  ;;  %61 = vrot.lane.b32.xlu1 %v98_v10, %s124_s8 }
  0x16   :  { %67 = vrot.lane.b32.xlu0 %v99_v11, %s125_s13  ;;  %73 = vrot.lane.b32.xlu1 %v100_v12, %s126_s14 }
  0x1a   :  { %79 = vrot.lane.b32.xlu0 %v101_v13, %s127_s0 }
  0x74   :  { %v8_v14 = vpop.permute.xlu0 %7   ;;  %v20_v15 = vpop.permute.xlu1 %19  }
  0x75   :  { %10 = vst.msk [vmem:[#allocation0] sm:$0x1] %vm9_vm1, %v8_v14  }
  0x78   :  { %v14_v16 = vpop.permute.xlu0 %13   ;;  %v26_v17 = vpop.permute.xlu1 %25  }
  0x79   :  { %16 = vst.msk [vmem:[#allocation0] sm:$0x1] %vm15_vm2, %v14_v16  }
  0x7a   :  { %22 = vst.msk [vmem:[#allocation0] sm:$0x1] %vm21_vm3, %v20_v15  }
  0x7b   :  { %28 = vst.msk [vmem:[#allocation0] sm:$0x1] %vm27_vm4, %v26_v17  }
  0x7c   :  { %v32_v18 = vpop.permute.xlu0 %31   ;;  %v38_v19 = vpop.permute.xlu1 %37  }
  0x7d   :  { %34 = vst.msk [vmem:[#allocation0] sm:$0x1] %vm33_vm5, %v32_v18  }
  0x7e   :  { %40 = vst.msk [vmem:[#allocation0] sm:$0x1] %vm39_vm6, %v38_v19  }
  0x80   :  { %v44_v20 = vpop.permute.xlu0 %43   ;;  %v50_v21 = vpop.permute.xlu1 %49  }
  0x81   :  { %46 = vst.msk [vmem:[#allocation0] sm:$0x1] %vm45_vm7, %v44_v20  }
  0x82   :  { %52 = vst.msk [vmem:[#allocation0] sm:$0x1] %vm51_vm8, %v50_v21  }
  0x84   :  { %v56_v22 = vpop.permute.xlu0 %55   ;;  %v62_v23 = vpop.permute.xlu1 %61  }
  0x85   :  { %58 = vst.msk [vmem:[#allocation0] sm:$0x1] %vm57_vm9, %v56_v22  }
  0x86   :  { %64 = vst.msk [vmem:[#allocation0] sm:$0x1] %vm63_vm10, %v62_v23  }
  0x88   :  { %v68_v24 = vpop.permute.xlu0 %67   ;;  %v74_v25 = vpop.permute.xlu1 %73  }
  0x89   :  { %70 = vst.msk [vmem:[#allocation0] sm:$0x1] %vm69_vm11, %v68_v24  }
  0x8a   :  { %76 = vst.msk [vmem:[#allocation0] sm:$0x1] %vm75_vm12, %v74_v25  }
  0x8c   :  { %v80_v26 = vpop.permute.xlu0 %79  }
  0x8d   :  { %82 = vst.msk [vmem:[#allocation0] sm:$0x1] %vm81_vm13, %v80_v26  }
  0x94   :  { %v86_v27 = vld [vmem:[#allocation0] sm:$0x1] }
  0x95   :  { %88 = vst [vmem:[%s184_s1] sm:$0x1] %v86_v27 }

// kernel: task_layer.1
= control target key start
LH: loop header
LB: loop body
LE: loop exit
PB: predicated region body
PF: predicated region fallthrough
CT: control target
= control target key end

     0   :  { %vm35_vm0 = vcmask 523264   ;;  %v231_v40 = vlaneseq  ;;  %s685_s1 = inlined_call_operand.vmem [shape: f32[3,64,128], index: 1, kind: input, shape index: {}]   ;;  %s686_s0 = inlined_call_operand.vmem [shape: f32[32,64], index: 0, kind: input, shape index: {}]   ;;  %s687_s2 = inlined_call_operand.vmem [shape: f32[1,128], index: 2, kind: input, shape index: {}]   ;;  %s688_s3 = inlined_call_operand.vmem [shape: f32[2,16,128], index: 3, kind: output, shape index: {}]  }
   0x1   :  { %v359_v0 = vld [vmem:[%s685_s1 + $0x40] sm:$0xff]  ;;  %v360_v1 = vld [vmem:[%s685_s1 + $0x48] sm:$0xff]  ;;  %v361_v5 = vld [vmem:[%s685_s1 + $0x50] sm:$0xff] }
   0x2   :  { %v371_v2 = vld [vmem:[%s685_s1 + $0x80] sm:$0xff]  ;;  %v490_v3 = vpack.c.bf16 %v360_v1, %v359_v0  ;;  %v372_v4 = vld [vmem:[%s685_s1 + $0x88] sm:$0xff]  ;;  %v362_v6 = vld [vmem:[%s685_s1 + $0x58] sm:$0xff]  ;;  %v232_v41 = vshrl.u32 %v231_v40, 7 }
   0x3   :  { %v506_v7 = vpack.c.bf16 %v372_v4, %v371_v2  ;;  %v494_v8 = vpack.c.bf16 %v362_v6, %v361_v5  ;;  %v373_v9 = vld [vmem:[%s685_s1 + $0x90] sm:$0xff]  ;;  %v374_v10 = vld [vmem:[%s685_s1 + $0x98] sm:$0xff]  ;;  %v363_v11 = vld [vmem:[%s685_s1 + $0x60] sm:$0xff] }
   0x4   :  { %491 = vmatprep.subr.bf16.mxu0 %v490_v3  ;;  %v510_v12 = vpack.c.bf16 %v374_v10, %v373_v9  ;;  %v364_v13 = vld [vmem:[%s685_s1 + $0x68] sm:$0xff]  ;;  %v375_v14 = vld [vmem:[%s685_s1 + $0xa0] sm:$0xff]  ;;  %v365_v19 = vld [vmem:[%s685_s1 + $0x70] sm:$0xff]  ;;  %vm233_vm1 = vcmp.lt.s32.totalorder %v232_v41, 7  ;;  %vm327_vm2 = vcmp.lt.s32.totalorder %v232_v41, 6 }
   0x5   :  { %v376_v15 = vld [vmem:[%s685_s1 + $0xa8] sm:$0xff]  ;;  %507 = vmatprep.subr.bf16.mxu1 %v506_v7  ;;  %493 = vmatpush3.bf16.msra.mxu0 %v490_v3  ;;  %v498_v16 = vpack.c.bf16 %v364_v13, %v363_v11  ;;  %v14_v17 = vld [vmem:[%s686_s0] sm:$0xff]  ;;  %v366_v20 = vld [vmem:[%s685_s1 + $0x78] sm:$0xff] }
   0x6   :  { %509 = vmatpush3.bf16.msra.mxu1 %v506_v7  ;;  %495 = vmatprep.subr.bf16.mxu0 %v494_v8  ;;  %v514_v18 = vpack.c.bf16 %v376_v15, %v375_v14  ;;  %v377_v21 = vld [vmem:[%s685_s1 + $0xb0] sm:$0xff]  ;;  %v378_v22 = vld [vmem:[%s685_s1 + $0xb8] sm:$0xff]  ;;  %v502_v23 = vpack.c.bf16 %v366_v20, %v365_v19  ;;  %v18_v25 = vld [vmem:[%s685_s1] sm:$0xff] }
   0x7   :  { %511 = vmatprep.subr.bf16.mxu1 %v510_v12  ;;  %440 = vmatprep.mubr.msk.f32.mxu0 %vm35_vm0, %v14_v17  ;;  %v518_v24 = vpack.c.bf16 %v378_v22, %v377_v21  ;;  %v19_v26 = vld [vmem:[%s685_s1 + $0x8] sm:$0xff]  ;;  %v20_v28 = vld [vmem:[%s685_s1 + $0x10] sm:$0xff]  ;;  %v21_v29 = vld [vmem:[%s685_s1 + $0x18] sm:$0xff] }
   0x8   :  { %462 = vmatprep.mubr.msk.f32.mxu1 %vm35_vm0, %v14_v17  ;;  %v522_v27 = vpack.c.bf16 %v19_v26, %v18_v25  ;;  %v15_v30 = vld [vmem:[%s686_s0 + $0x8] sm:$0xff]  ;;  %v16_v31 = vld [vmem:[%s686_s0 + $0x10] sm:$0xff]  ;;  %v526_v32 = vpack.c.bf16 %v21_v29, %v20_v28  ;;  %v22_v33 = vld [vmem:[%s685_s1 + $0x20] sm:$0xff] }
   0x9   :  { %497 = vmatpush3.bf16.msra.mxu0 %v494_v8  ;;  %v23_v34 = vld [vmem:[%s685_s1 + $0x28] sm:$0xff]  ;;  %v17_v35 = vld [vmem:[%s686_s0 + $0x18] sm:$0xff]  ;;  %v24_v37 = vld [vmem:[%s685_s1 + $0x30] sm:$0xff] }
   0xa   :  { %513 = vmatpush3.bf16.msra.mxu1 %v510_v12  ;;  %499 = vmatprep.subr.bf16.mxu0 %v498_v16  ;;  %v530_v36 = vpack.c.bf16 %v23_v34, %v22_v33  ;;  %v25_v38 = vld [vmem:[%s685_s1 + $0x38] sm:$0xff]  ;;  %v387_v6 = vld [vmem:[%s687_s2] ss:$0 sm:$0xff] }
   0xb   :  { %515 = vmatprep.subr.bf16.mxu1 %v514_v18  ;;  %v534_v39 = vpack.c.bf16 %v25_v38, %v24_v37 }
   0xd   :  { %501 = vmatpush3.bf16.msra.mxu0 %v498_v16 }
   0xe   :  { %517 = vmatpush3.bf16.msra.mxu1 %v514_v18  ;;  %503 = vmatprep.subr.bf16.mxu0 %v502_v23 }
   0xf   :  { %519 = vmatprep.subr.bf16.mxu1 %v518_v24 }
  0x11   :  { %505 = vmatpush3.bf16.msra.mxu0 %v502_v23 }
  0x12   :  { %521 = vmatpush3.bf16.msra.mxu1 %v518_v24  ;;  %523 = vmatprep.subr.bf16.mxu0 %v522_v27 }
  0x13   :  { %538 = vmatprep.subr.bf16.mxu1 %v522_v27 }
  0x14   :  { %441 = vmatmul.mubr.msk.f32.vlgmr.msra.gmra.mrb[0].mxu0 %vm35_vm0, %v15_v30 }
  0x15   :  { %463 = vmatmul.mubr.msk.f32.vlgmr.msra.gmra.mrb[0].mxu1 %vm35_vm0, %v15_v30  ;;  %525 = vmatpush3.bf16.msra.mxu0 %v522_v27 }
  0x16   :  { %542 = vmatpush3.bf16.msra.mxu1 %v522_v27  ;;  %443 = vmatprep.mubr.msk.f32.mxu0 %vm35_vm0, %v16_v31 }
  0x17   :  { %465 = vmatprep.mubr.msk.f32.mxu1 %vm35_vm0, %v16_v31  ;;  %527 = vmatprep.subr.bf16.mxu0 %v526_v32 }
  0x18   :  { %444 = vmatmul.mubr.msk.f32.gmra.mrb[2].mxu0 %vm35_vm0, %v17_v35  ;;  %539 = vmatprep.subr.bf16.mxu1 %v526_v32 }
  0x19   :  { %466 = vmatmul.mubr.msk.f32.gmra.mrb[2].mxu1 %vm35_vm0, %v17_v35  ;;  %529 = vmatpush3.bf16.msra.mxu0 %v526_v32 }
  0x1a   :  { %543 = vmatpush3.bf16.msra.mxu1 %v526_v32  ;;  %531 = vmatprep.subr.bf16.mxu0 %v530_v36 }
  0x1b   :  { %540 = vmatprep.subr.bf16.mxu1 %v530_v36  ;;  %484 = vmatprep.mubr.msk.f32.mxu0 %vm35_vm0, %v14_v17 }
  0x1c   :  { %487 = vmatprep.mubr.msk.f32.mxu1 %vm35_vm0, %v16_v31 }
  0x1d   :  { %533 = vmatpush3.bf16.msra.mxu0 %v530_v36 }
  0x1e   :  { %544 = vmatpush3.bf16.msra.mxu1 %v530_v36  ;;  %535 = vmatprep.subr.bf16.mxu0 %v534_v39 }
  0x1f   :  { %541 = vmatprep.subr.bf16.mxu1 %v534_v39 }
  0x21   :  { %537 = vmatpush3.bf16.msra.mxu0 %v534_v39 }
  0x22   :  { %545 = vmatpush3.bf16.msra.mxu1 %v534_v39 }
  0x24   :  { %485 = vmatmul.mubr.msk.f32.vlgmr.msra.gmra.mrb[4].mxu0 %vm35_vm0, %v15_v30 }
  0x25   :  { %488 = vmatmul.mubr.msk.f32.vlgmr.msra.gmra.mrb[4].mxu1 %vm35_vm0, %v17_v35 }
  0xe7   :  { %v442_v42 = vpop.f32.mrb[0].mxu0 }
  0xe8   :  { %v228_v43 = vrot.slane %v442_v42, 1  ;;  %v464_v44 = vpop.f32.mrb[0].mxu1  ;;  %v114_v45 = vpop.f32.mrb[1].mxu0 }
  0xe9   :  { %v324_v46 = vrot.slane %v464_v44, 2  ;;  %v227_v47 = vrot.slane %v114_v45, 1  ;;  %v208_v48 = vpop.f32.mrb[1].mxu1 }
  0xea   :  { %v323_v49 = vrot.slane %v208_v48, 2 }
  0xeb   :  { %v445_v50 = vpop.f32.mrb[2].mxu0  ;;  %v236_v51 = vsel %vm233_vm1, %v227_v47, %v228_v43 }
  0xec   :  { %v230_v52 = vrot.slane %v445_v50, 1  ;;  %v467_v53 = vpop.f32.mrb[2].mxu1  ;;  %v124_v54 = vpop.f32.mrb[3].mxu0  ;;  %v330_v55 = vsel %vm327_vm2, %v323_v49, %v324_v46 }
  0xed   :  { %v326_v56 = vrot.slane %v467_v53, 2  ;;  %v229_v57 = vrot.slane %v124_v54, 1  ;;  %v218_v58 = vpop.f32.mrb[3].mxu1 }
  0xee   :  { %v325_v59 = vrot.slane %v218_v58, 2  ;;  %v237_v60 = vsel %vm233_vm1, %v230_v52, %v227_v47 }
  0xef   :  { %v235_v61 = vsel %vm233_vm1, %v228_v43, %v229_v57  ;;  %v331_v62 = vsel %vm327_vm2, %v326_v56, %v323_v49  ;;  %v234_v63 = vsel %vm233_vm1, %v229_v57, %v230_v52 }
  0xf0   :  { %v329_v0 = vsel %vm327_vm2, %v324_v46, %v325_v59  ;;  %v328_v1 = vsel %vm327_vm2, %v325_v59, %v326_v56 }
  0xf7   :  { %v486_v2 = vpop.f32.mrb[4].mxu0 }
  0xf8   :  { %v310_v3 = vadd.f32 %v486_v2, %v235_v61  ;;  %v489_v4 = vpop.f32.mrb[4].mxu1  ;;  %v304_v5 = vpop.f32.mrb[5].mxu0 }
  0xf9   :  { %v320_v7 = vadd.f32 %v489_v4, %v237_v60  ;;  %v305_v8 = vadd.f32 %v304_v5, %v236_v51  ;;  %v314_v9 = vpop.f32.mrb[5].mxu1 }
  0xfa   :  { %v333_v10 = vadd.f32 %v329_v0, %v310_v3  ;;  %v315_v11 = vadd.f32 %v314_v9, %v234_v63 }
  0xfb   :  { %v335_v12 = vadd.f32 %v331_v62, %v320_v7  ;;  %v332_v13 = vadd.f32 %v330_v55, %v305_v8 }
  0xfc   :  { %v344_v14 = vadd.f32 %v387_v6, %v333_v10  ;;  %v334_v15 = vadd.f32 %v328_v1, %v315_v11 }
  0xfd   :  { %v346_v16 = vadd.f32 %v387_v6, %v335_v12  ;;  %v343_v17 = vadd.f32 %v387_v6, %v332_v13 }
  0xfe   :  { %v348_v18 = vmax.f32 %v344_v14, 0.0  ;;  %v345_v19 = vadd.f32 %v387_v6, %v334_v15 }
  0xff   :  { %v350_v20 = vmax.f32 %v346_v16, 0.0  ;;  %v347_v21 = vmax.f32 %v343_v17, 0.0 }
 0x100   :  { %352 = vst [vmem:[%s688_s3 + $0x8] sm:$0xff] %v348_v18  ;;  %v349_v22 = vmax.f32 %v345_v19, 0.0 }
 0x101   :  { %354 = vst [vmem:[%s688_s3 + $0x18] sm:$0xff] %v350_v20  ;;  %351 = vst [vmem:[%s688_s3] sm:$0xff] %v347_v21 }
 0x102   :  { %353 = vst [vmem:[%s688_s3 + $0x10] sm:$0xff] %v349_v22 }

</bundles_post_ra>
